<compile_context>
chip_gen: v7x
topology: tpu7x:2x2x1
jax: 0.10.0
libtpu: 0.0.40
codegen_flags: <defaults>
</compile_context>

<pallas_src>
import functools

import jax
import jax.numpy as jnp
from jax.experimental import pallas as pl
from jax.experimental.pallas import tpu as pltpu


def _cdiv(a, b):
    return -(-a // b)


def _diff_noise_kernel(x_ref, o_ref, *, n):
    x = x_ref[...]
    # shifted[:, c] == x[:, c-1]; the wraparound at c == 0 is harmless because
    # column 0 always has even flat parity (CW is even) -> pass-through.
    shifted = pltpu.roll(x, shift=1, axis=1)            # XLU slot; axis must be >= 0
    col = jax.lax.broadcasted_iota(jnp.int32, (1, x.shape[1]), 1)
    is_odd = (col & 1) == 1                             # (1, CW), broadcasts over rows
    # Division (not multiply-by-reciprocal) to match torch's `x[t] / n` exactly.
    o_ref[...] = jnp.where(is_odd, x - shifted / n, x)


def _pick_tile(T, sub, row_bytes, target_bytes, *, min_grid=8, min_block_bytes=1 << 20):
    """Row-tile (multiple of `sub`; need NOT divide T) within the block budget."""
    max_rows = max(sub, (target_bytes // row_bytes) // sub * sub)
    # Keep >= min_grid grid steps (double-buffered pipeline + megacore / 2-TC
    # sharding) as long as blocks stay big enough to amortize ~0.35us/step.
    cap = (T // min_grid) // sub * sub
    if cap >= sub and cap * row_bytes >= min_block_bytes:
        max_rows = min(max_rows, cap)
    if max_rows >= T:
        return T                                        # single full-extent block
    # Prefer an even grid length: v7x shards the "parallel" axis across 2 TCs.
    tile = max_rows
    for cand in range(tile, max(sub - 1, tile - 8 * sub), -sub):
        if _cdiv(T, cand) % 2 == 0:
            return cand
    return tile


def _chip_config():
    """(target_block_bytes, vmem_limit_bytes) per TPU generation."""
    try:
        kind = jax.devices()[0].device_kind.lower()
    except Exception:
        kind = ""
    if "v7" in kind:
        # v7x: ~3.2 TB/s HBM but only 64 MiB VMEM; 8 MiB blocks halve the
        # per-step tax, 2x(in+out) double-buffered = 32 MiB, 48 MiB scoped
        # leaves headroom for compiler scratch.
        return 8 * 1024 * 1024, 48 * 1024 * 1024
    # v5e / v6e: 128 MiB VMEM; explicit 32 MiB lifts v5e's 16 MiB default.
    return 4 * 1024 * 1024, 32 * 1024 * 1024


def differential_noise(x, n=50, layers=64, *, target_block_bytes=None):
    """x: (B, C, H, W) float array (NCHW, same as the PyTorch module)."""
    # TODO(synk): only the layers==64 path (independent pairs of 2) is
    # implemented; layers in {128, 256, 512} use sequential in-group
    # recurrences (and the 256 branch has an `i`-vs-`t` bug in the reference).
    assert layers == 64, "only the default layers=64 variant is implemented"
    n_eff = float(n * int(layers // 64))

    B, C, H, W = x.shape
    assert H == W
    L = H * W
    itemsize = jnp.dtype(x.dtype).itemsize
    sub = {4: 8, 2: 16, 1: 32}.get(itemsize, 8)         # dtype-aware sublane multiple

    block_bytes, vmem_limit = _chip_config()
    if target_block_bytes is not None:
        block_bytes = target_block_bytes

    # Lane-dense (T, CW) layout. Pad each flattened map to a multiple of 256
    # when needed so every map starts at an even flat index (flat parity ==
    # in-map parity) and the total is a multiple of 128 (no masked stores).
    total = B * C * L
    if L % 2 == 0 and total % 128 == 0:
        L_pad = L
    else:
        L_pad = _cdiv(L, 256) * 256
    total_pad = B * C * L_pad

    x_flat = x.reshape(B * C, L)
    if L_pad != L:
        x_flat = jnp.pad(x_flat, ((0, 0), (0, L_pad - L)))

    # CW: largest divisor of total_pad that is a multiple of 128, capped at 4096.
    CW = 128
    for cand in range(min(4096, total_pad), 127, -128):
        if total_pad % cand == 0:
            CW = cand
            break
    T = total_pad // CW
    x2 = x_flat.reshape(T, CW)

    tile_t = _pick_tile(T, sub, CW * itemsize, block_bytes)
    grid = (_cdiv(T, tile_t),)                          # ragged last block is OK

    out2 = pl.pallas_call(
        functools.partial(_diff_noise_kernel, n=n_eff),
        out_shape=jax.ShapeDtypeStruct((T, CW), x2.dtype),
        grid=grid,
        in_specs=[pl.BlockSpec((tile_t, CW), lambda i: (i, 0))],
        out_specs=pl.BlockSpec((tile_t, CW), lambda i: (i, 0)),
        # Even positions are pass-through, so in-place is semantically free;
        # callers should donate x at the jit boundary to make it truly free.
        input_output_aliases={0: 0},
        cost_estimate=pl.CostEstimate(
            flops=3 * total_pad,
            transcendentals=0,
            bytes_accessed=2 * total_pad * itemsize,
        ),
        compiler_params=pltpu.CompilerParams(
            dimension_semantics=("parallel",),
            vmem_limit_bytes=vmem_limit,
        ),
    )(x2)

    out_flat = out2.reshape(B * C, L_pad)
    if L_pad != L:
        out_flat = out_flat[:, :L]
    return out_flat.reshape(B, C, H, W)


def _reference(x, n=50.0):
    """Pure-JAX reference of the layers==64 forward pass."""
    B, C, H, W = x.shape
    L = H * W
    flat = x.reshape(B, C, L)
    shifted = jnp.roll(flat, 1, axis=-1)
    idx = jnp.arange(L)
    out = jnp.where((idx % 2) == 1, flat - shifted / n, flat)
    return out.reshape(B, C, H, W)


if __name__ == "__main__":
    key = jax.random.PRNGKey(0)

    # Primary check: aligned NCHW shape (no padding path), w == h.
    x = jax.random.normal(key, (2, 4, 16, 16), dtype=jnp.float32)
    out = jax.block_until_ready(differential_noise(x, n=50, layers=64))
    ref = _reference(x, n=50.0)
    assert out.shape == x.shape and out.dtype == x.dtype
    assert jnp.allclose(out, ref, atol=1e-6, rtol=1e-6), "mismatch (aligned path)"

    # Secondary check: odd spatial size -> exercises the lane-dense pad path.
    x2 = jax.random.normal(jax.random.PRNGKey(1), (1, 3, 15, 15), dtype=jnp.float32)
    out2 = jax.block_until_ready(differential_noise(x2, n=50, layers=64))
    ref2 = _reference(x2, n=50.0)
    assert out2.shape == x2.shape and out2.dtype == x2.dtype
    assert jnp.allclose(out2, ref2, atol=1e-6, rtol=1e-6), "mismatch (padded path)"

    print("KERNEL_OK")
</pallas_src>

<mosaic_0001>
module attributes {stable_mosaic.version = 11 : i64} {
  func.func @_diff_noise_kernel(%arg0: i32, %arg1: memref<1x2048xf32, #tpu.memory_space<vmem>>, %arg2: memref<1x2048xf32, #tpu.memory_space<vmem>>) attributes {dimension_semantics = [#tpu.dimension_semantics<parallel>], iteration_bounds = array<i64: 1>, scalar_prefetch = 0 : i64, scratch_operands = 0 : i64, tpu.core_type = #tpu.core_type<tc>, window_params = [{transform_indices = @transform_0, window_bounds = array<i64: 1, 2048>}, {transform_indices = @transform_1, window_bounds = array<i64: 1, 2048>}]} {
    %c0 = arith.constant 0 : index
    %c0_0 = arith.constant 0 : index
    %0 = vector.load %arg1[%c0, %c0_0] : memref<1x2048xf32, #tpu.memory_space<vmem>>, vector<1x2048xf32>
    %c1_i32 = arith.constant 1 : i32
    %1 = tpu.dynamic_rotate %0 by %c1_i32 dim 1 : vector<1x2048xf32>, i32 -> vector<1x2048xf32>
    %2 = tpu.iota {dimensions = array<i32: 1>} : vector<1x2048xi32>
    %c1_i32_1 = arith.constant 1 : i32
    %3 = vector.broadcast %c1_i32_1 : i32 to vector<1x2048xi32>
    %4 = arith.andi %2, %3 : vector<1x2048xi32>
    %c1_i32_2 = arith.constant 1 : i32
    %5 = vector.broadcast %c1_i32_2 : i32 to vector<1x2048xi32>
    %6 = arith.cmpi eq, %4, %5 : vector<1x2048xi32>
    %cst = arith.constant 5.000000e+01 : f32
    %7 = vector.broadcast %cst : f32 to vector<1x2048xf32>
    %8 = arith.divf %1, %7 : vector<1x2048xf32>
    %9 = arith.subf %0, %8 : vector<1x2048xf32>
    %10 = arith.select %6, %9, %0 : vector<1x2048xi1>, vector<1x2048xf32>
    %c0_3 = arith.constant 0 : index
    %c0_4 = arith.constant 0 : index
    %11 = vector.load %arg2[%c0_3, %c0_4] : memref<1x2048xf32, #tpu.memory_space<vmem>>, vector<1x2048xf32>
    tpu.vector_store %arg2[%c0_3, %c0_4], %10 {strides = array<i32>} : memref<1x2048xf32, #tpu.memory_space<vmem>>, vector<1x2048xf32>,
    return
  }
  func.func @transform_0(%arg0: i32) -> (i32, i32) {
    %c0_i32 = arith.constant 0 : i32
    %c0_i32_0 = arith.constant 0 : i32
    return %arg0, %c0_i32 : i32, i32
  }
  func.func @transform_1(%arg0: i32) -> (i32, i32) {
    %c0_i32 = arith.constant 0 : i32
    %c0_i32_0 = arith.constant 0 : i32
    return %arg0, %c0_i32 : i32, i32
  }
}

</mosaic_0001>

<bundles_post_ra>
// kernel: tpu_custom_call.1
= control target key start
LH: loop header
LB: loop body
LE: loop exit
PB: predicated region body
PF: predicated region fallthrough
CT: control target
= control target key end

     0   :  { %6 = vsyncpa [#allocation3], 0  ;;  %s992_s0 = inlined_call_operand.hbm [shape: f32[1,2048], index: 0, kind: input, shape index: {}, may-alias: {0,1}]   ;;  %s993_s1 = inlined_call_operand.hbm [shape: f32[1,2048], index: 1, kind: output, shape index: {}, may-alias: {0,1}]  }
   0x1   :  { %7 = vsyncpa [#allocation4], 0  ;;  %s621_s6 = smov [#allocation2]   ;;  %s573_s10 = scalar_lea.hbm %s992_s0, 256 }
   0x2   :  { %s14_s7 = sshll.u32 %s621_s6, 4  ;;  %p574_p0 = scmp.ne.s32.totalorder %s992_s0, %s573_s10  ;;  %s15_s7 = int_to_ptr.vmem [resolvable:$true] %s14_s7 }
   0x3   :  { %p577_p1 = scmp.lt.u32.totalorder %s573_s10, %s992_s0 }
   0x5   :  { %p579_p2 = pnand %p577_p1, %p574_p0 }
   0x7   :  { %582 = shalt.err (!%p579_p2)
}
   0x8   :  { %s583_s15 = scalar_lea.vmem %s15_s7, 256  ;;  %p588_p4 = scmp.lt.s32.totalorder %s15_s7, %s15_s7 }
   0x9   :  { %p584_p3 = scmp.ne.s32.totalorder %s15_s7, %s583_s15  ;;  %p589_p5 = scmp.lt.s32.totalorder %s583_s15, %s583_s15 }
   0xb   :  { %p590_p6 = por %p589_p5, %p588_p4 }
   0xd   :  { %p591_p7 = pnand %p590_p6, %p584_p3 }
   0xf   :  { %594 = shalt.err (!%p591_p7)
}
  0x10   :  { %17 = dma.hbm_to_vmem [thread:$0]  %s992_s0, 256, %s15_s7, [#allocation3]  }
  0x11   :  { %617 = dma.done.wait [#allocation3], 256  }
  0x12   :  { %618 = vsyncadd [#allocation3], 4294967040  ;;  %v25_v0 = vlaneseq  ;;  %v655_v6 = vld [vmem:[#allocation2] sm:$0xff]  ;;  %s622_s0 = smov 1   ;;  %v709_v19 = vld [vmem:[#allocation2 + $0x8] sm:$0xff]  ;;  %s624_s18 = smov [#allocation5]  }
  0x13   :  { %v623_v29 = vmov 1966171168   ;;  %s560_s19 = sshll.u32 %s624_s18, 4  ;;  %s561_s19 = int_to_ptr.vmem [resolvable:$true] %s560_s19 }
  0x14   :  { %v26_v1 = vshrl.u32 %v25_v0, 7  ;;  %v763_v28 = vand.u32 127, %v25_v0  ;;  %v241_v30 = vunpack.c.l.s4 %v623_v29  ;;  %s595_s20 = scalar_lea.vmem %s561_s19, 256  ;;  %p600_p9 = scmp.lt.s32.totalorder %s561_s19, %s561_s19 }
  0x15   :  { %p596_p8 = scmp.ne.s32.totalorder %s561_s19, %s595_s20  ;;  %p601_p10 = scmp.lt.s32.totalorder %s595_s20, %s595_s20 }
  0x16   :  { %v647_v2 = vsub.s32 2, %v26_v1  ;;  %v649_v3 = vsub.s32 0, %v26_v1  ;;  %v651_v4 = vsub.s32 3, %v26_v1  ;;  %v653_v5 = vsub.s32 1, %v26_v1 }
  0x17   :  { %v677_v11 = vsub.s32 5, %v26_v1  ;;  %v679_v12 = vsub.s32 4, %v26_v1  ;;  %v693_v15 = vsub.s32 7, %v26_v1  ;;  %v695_v16 = vsub.s32 6, %v26_v1  ;;  %p602_p11 = por %p601_p10, %p600_p9 }
  0x18   :  { %v659_v7 = vrot.slane %v655_v6, %v647_v2  ;;  %v663_v8 = vrot.slane %v655_v6, %v649_v3  ;;  %v671_v9 = vrot.slane %v655_v6, %v651_v4  ;;  %v675_v10 = vrot.slane %v655_v6, %v653_v5 }
  0x19   :  { %v687_v13 = vrot.slane %v655_v6, %v677_v11  ;;  %v691_v14 = vrot.slane %v655_v6, %v679_v12  ;;  %v703_v17 = vrot.slane %v655_v6, %v693_v15  ;;  %v707_v18 = vrot.slane %v655_v6, %v695_v16  ;;  %p603_p12 = pnand %p602_p11, %p596_p8 }
  0x1a   :  { %109 = vrot.lane.b32.xlu1 %v659_v7, %s622_s0  ;;  %105 = vrot.lane.b32.xlu0 %v663_v8, %s622_s0  ;;  %v717_v20 = vrot.slane %v709_v19, %v653_v5  ;;  %v721_v21 = vrot.slane %v709_v19, %v649_v3  ;;  %v729_v22 = vrot.slane %v709_v19, %v651_v4  ;;  %v242_v33 = vunpack.c.0.s8 %v241_v30 }
  0x1b   :  { %v733_v23 = vrot.slane %v709_v19, %v647_v2  ;;  %v741_v24 = vrot.slane %v709_v19, %v677_v11  ;;  %v745_v25 = vrot.slane %v709_v19, %v679_v12  ;;  %v753_v26 = vrot.slane %v709_v19, %v693_v15 }
  0x1c   :  { %v757_v27 = vrot.slane %v709_v19, %v695_v16  ;;  %vm139_vm0 = vcmp.lt.s32.totalorder %v763_v28, 1  ;;  %v772_v38 = vsub.s32 %v242_v33, %v26_v1 }
  0x1d   :  { %996 = vst [vmem:[#allocation8_spill] sm:$0xff] %v753_v26 }
  0x1e   :  { %111 = vrot.lane.b32.xlu1 %v671_v9, %s622_s0  ;;  %107 = vrot.lane.b32.xlu0 %v675_v10, %s622_s0  ;;  %997 = vst [vmem:[#allocation9_spill] sm:$0xff] %v757_v27 }
  0x22   :  { %115 = vrot.lane.b32.xlu1 %v687_v13, %s622_s0  ;;  %113 = vrot.lane.b32.xlu0 %v691_v14, %s622_s0 }
  0x26   :  { %119 = vrot.lane.b32.xlu1 %v703_v17, %s622_s0  ;;  %117 = vrot.lane.b32.xlu0 %v707_v18, %s622_s0 }
  0x2a   :  { %123 = vrot.lane.b32.xlu1 %v717_v20, %s622_s0  ;;  %121 = vrot.lane.b32.xlu0 %v721_v21, %s622_s0 }
  0x2e   :  { %127 = vrot.lane.b32.xlu1 %v729_v22, %s622_s0  ;;  %125 = vrot.lane.b32.xlu0 %v733_v23, %s622_s0 }
  0x32   :  { %131 = vrot.lane.b32.xlu1 %v741_v24, %s622_s0  ;;  %129 = vrot.lane.b32.xlu0 %v745_v25, %s622_s0 }
  0x36   :  { %135 = vrot.lane.b32.xlu1 %v753_v26, %s622_s0  ;;  %133 = vrot.lane.b32.xlu0 %v757_v27, %s622_s0 }
  0x8c   :  { %v110_v31 = vpop.permute.xlu1 %109  ;;  %v765_v32 = vpop.permute.xlu0 %105 }
  0x90   :  { %v112_v34 = vpop.permute.xlu1 %111  ;;  %v108_v35 = vpop.permute.xlu0 %107 }
  0x91   :  { %v152_v36 = vsel %vm139_vm0, %v110_v31, %v112_v34  ;;  %v153_v37 = vsel %vm139_vm0, %v108_v35, %v110_v31 }
  0x92   :  { %v207_v39 = vmul.f32 0.02, %v152_v36  ;;  %v206_v40 = vmul.f32 0.02, %v153_v37 }
  0x94   :  { %v237_v41 = vcombine.low %v206_v40, %v207_v39  ;;  %v116_v42 = vpop.permute.xlu1 %115  ;;  %v114_v43 = vpop.permute.xlu0 %113 }
  0x95   :  { %v150_v44 = vsel %vm139_vm0, %v114_v43, %v116_v42  ;;  %v151_v45 = vsel %vm139_vm0, %v112_v34, %v114_v43 }
  0x96   :  { %v779_v46 = vrot.slane %v237_v41, %v772_v38  ;;  %v208_v47 = vmul.f32 0.02, %v151_v45  ;;  %v209_v48 = vmul.f32 0.02, %v150_v44 }
  0x98   :  { %v238_v49 = vcombine.low %v208_v47, %v209_v48  ;;  %v120_v50 = vpop.permute.xlu1 %119  ;;  %v118_v51 = vpop.permute.xlu0 %117  ;;  %v156_v47 = vadd.s32 128, %v763_v28  ;;  %v157_v48 = vadd.s32 256, %v763_v28 }
  0x99   :  { %v148_v52 = vsel %vm139_vm0, %v118_v51, %v120_v50  ;;  %v149_v53 = vsel %vm139_vm0, %v116_v42, %v118_v51 }
  0x9a   :  { %v260_v54 = vrot.slane %v238_v49, %v772_v38  ;;  %v210_v55 = vmul.f32 0.02, %v149_v53  ;;  %v211_v56 = vmul.f32 0.02, %v148_v52  ;;  %v154_v49 = vsel %vm139_vm0, %v765_v32, %v108_v35 }
  0x9b   :  { %v158_v53 = vadd.s32 384, %v763_v28  ;;  %v163_v35 = vadd.s32 1024, %v763_v28 }
  0x9c   :  { %v239_v57 = vcombine.low %v210_v55, %v211_v56  ;;  %v124_v58 = vpop.permute.xlu1 %123  ;;  %v122_v59 = vpop.permute.xlu0 %121  ;;  %v160_v55 = vadd.s32 640, %v763_v28  ;;  %v161_v56 = vadd.s32 768, %v763_v28 }
  0x9d   :  { %v146_v60 = vsel %vm139_vm0, %v122_v59, %v124_v58  ;;  %v147_v61 = vsel %vm139_vm0, %v120_v50, %v122_v59 }
  0x9e   :  { %v267_v62 = vrot.slane %v239_v57, %v772_v38  ;;  %v212_v63 = vmul.f32 0.02, %v147_v61  ;;  %v213_v0 = vmul.f32 0.02, %v146_v60  ;;  %v162_v61 = vadd.s32 896, %v763_v28 }
  0xa0   :  { %v269_v1 = vcombine.low %v260_v54, %v267_v62  ;;  %v285_v29 = vcombine.low %v212_v63, %v213_v0  ;;  %v128_v30 = vpop.permute.xlu1 %127  ;;  %v126_v31 = vpop.permute.xlu0 %125  ;;  %v159_v54 = vadd.s32 512, %v763_v28  ;;  %v205_v62 = vmul.f32 0.02, %v154_v49 }
  0xa1   :  { %v144_v33 = vsel %vm139_vm0, %v126_v31, %v128_v30  ;;  %v145_v34 = vsel %vm139_vm0, %v124_v58, %v126_v31  ;;  %v171_v49 = vand.u32 1, %v763_v28 }
  0xa2   :  { %v796_v36 = vrot.slane %v269_v1, %v772_v38  ;;  %v295_v37 = vrot.slane %v285_v29, %v772_v38  ;;  %v214_v39 = vmul.f32 0.02, %v145_v34  ;;  %v215_v40 = vmul.f32 0.02, %v144_v33 }
  0xa3   :  { %vm836_vm1 = vcmp.eq.s32.totalorder %v171_v49, 1 }
  0xa4   :  { %v286_v41 = vcombine.low %v214_v39, %v215_v40  ;;  %v132_v42 = vpop.permute.xlu1 %131  ;;  %v130_v43 = vpop.permute.xlu0 %129  ;;  %v165_v39 = vadd.s32 1280, %v763_v28  ;;  %v166_v40 = vadd.s32 1408, %v763_v28 }
  0xa5   :  { %v142_v44 = vsel %vm139_vm0, %v130_v43, %v132_v42  ;;  %v143_v45 = vsel %vm139_vm0, %v128_v30, %v130_v43  ;;  %v168_v43 = vadd.s32 1664, %v763_v28 }
  0xa6   :  { %v302_v50 = vrot.slane %v286_v41, %v772_v38  ;;  %v216_v51 = vmul.f32 0.02, %v143_v45  ;;  %v217_v52 = vmul.f32 0.02, %v142_v44  ;;  %v167_v41 = vadd.s32 1536, %v763_v28 }
  0xa7   :  { %v170_v45 = vadd.s32 1920, %v763_v28  ;;  %v182_v26 = vand.u32 1, %v166_v40 }
  0xa8   :  { %v317_v57 = vcombine.low %v295_v37, %v302_v50  ;;  %v287_v58 = vcombine.low %v216_v51, %v217_v52  ;;  %v136_v59 = vpop.permute.xlu1 %135  ;;  %v134_v60 = vpop.permute.xlu0 %133  ;;  %v164_v37 = vadd.s32 1152, %v763_v28  ;;  %v172_v50 = vand.u32 1, %v156_v47 }
  0xa9   :  { %v155_v63 = vsel %vm139_vm0, %v136_v59, %v765_v32  ;;  %v140_v0 = vsel %vm139_vm0, %v134_v60, %v136_v59  ;;  %v141_v1 = vsel %vm139_vm0, %v132_v42, %v134_v60  ;;  %v169_v42 = vadd.s32 1792, %v763_v28 }
  0xaa   :  { %v325_v29 = vrot.slane %v317_v57, %v772_v38  ;;  %v309_v30 = vrot.slane %v287_v58, %v772_v38  ;;  %v204_v31 = vmul.f32 0.02, %v155_v63  ;;  %v218_v33 = vmul.f32 0.02, %v141_v1 }
  0xab   :  { %v219_v34 = vmul.f32 0.02, %v140_v0  ;;  %v173_v52 = vand.u32 1, %v157_v48  ;;  %v174_v57 = vand.u32 1, %v158_v53  ;;  %v175_v58 = vand.u32 1, %v159_v54 }
  0xac   :  { %v236_v32 = vcombine.low %v204_v31, %v205_v62  ;;  %v176_v60 = vand.u32 1, %v160_v55  ;;  %v177_v62 = vand.u32 1, %v161_v56  ;;  %v178_v63 = vand.u32 1, %v162_v61 }
  0xad   :  { %v288_v44 = vcombine.low %v218_v33, %v219_v34  ;;  %v179_v1 = vand.u32 1, %v163_v35  ;;  %v180_v31 = vand.u32 1, %v164_v37  ;;  %v181_v33 = vand.u32 1, %v165_v39 }
  0xae   :  { %v246_v51 = vrot.slane %v236_v32, %v772_v38  ;;  %v183_v27 = vand.u32 1, %v167_v41  ;;  %v184_v28 = vand.u32 1, %v168_v43  ;;  %v185_v32 = vand.u32 1, %v169_v42 }
  0xaf   :  { %v316_v59 = vrot.slane %v288_v44, %v772_v38  ;;  %v186_v48 = vand.u32 1, %v170_v45  ;;  %vm841_vm2 = vcmp.eq.s32.totalorder %v172_v50, 1  ;;  %vm845_vm3 = vcmp.eq.s32.totalorder %v173_v52, 1 }
  0xb0   :  { %v268_v0 = vcombine.low %v246_v51, %v779_v46  ;;  %vm849_vm4 = vcmp.eq.s32.totalorder %v174_v57, 1  ;;  %vm854_vm5 = vcmp.eq.s32.totalorder %v175_v58, 1  ;;  %vm858_vm6 = vcmp.eq.s32.totalorder %v176_v60, 1 }
  0xb1   :  { %v318_v34 = vcombine.low %v309_v30, %v316_v59  ;;  %vm862_vm7 = vcmp.eq.s32.totalorder %v177_v62, 1  ;;  %vm866_vm8 = vcmp.eq.s32.totalorder %v178_v63, 1  ;;  %vm870_vm9 = vcmp.eq.s32.totalorder %v179_v1, 1 }
  0xb2   :  { %v276_v47 = vrot.slane %v268_v0, %v772_v38  ;;  %vm874_vm10 = vcmp.eq.s32.totalorder %v180_v31, 1  ;;  %vm879_vm11 = vcmp.eq.s32.totalorder %v181_v33, 1  ;;  %vm883_vm12 = vcmp.eq.s32.totalorder %v182_v26, 1 }
  0xb3   :  { %v332_v54 = vrot.slane %v318_v34, %v772_v38  ;;  %vm887_vm13 = vcmp.eq.s32.totalorder %v183_v27, 1  ;;  %vm892_vm14 = vcmp.eq.s32.totalorder %v184_v28, 1  ;;  %vm896_vm15 = vcmp.eq.s32.totalorder %v185_v32, 1 }
  0xb4   :  { %v284_v61 = vcombine.low %v276_v47, %v796_v36  ;;  %vm900_vm0 = vcmp.eq.s32.totalorder %v186_v48, 1 }
  0xb5   :  { %v333_v39 = vcombine.low %v325_v29, %v332_v54 }
  0xb6   :  { %v336_v43 = vsub.f32 %v655_v6, %v284_v61 }
  0xb7   :  { %v337_v45 = vsub.f32 %v709_v19, %v333_v39 }
  0xb8   :  { %v343_v26 = vrot.slane %v336_v43, %v649_v3  ;;  %v347_v27 = vrot.slane %v336_v43, %v653_v5  ;;  %v351_v51 = vrot.slane %v336_v43, %v647_v2  ;;  %v355_v19 = vrot.slane %v336_v43, %v651_v4 }
  0xb9   :  { %v359_v52 = vrot.slane %v336_v43, %v679_v12  ;;  %v363_v57 = vrot.slane %v336_v43, %v677_v11  ;;  %v367_v58 = vrot.slane %v336_v43, %v695_v16  ;;  %v371_v59 = vrot.slane %v336_v43, %v693_v15 }
  0xba   :  { %v375_v60 = vrot.slane %v337_v45, %v649_v3  ;;  %v379_v62 = vrot.slane %v337_v45, %v653_v5  ;;  %v383_v63 = vrot.slane %v337_v45, %v647_v2  ;;  %v387_v0 = vrot.slane %v337_v45, %v651_v4 }
  0xbb   :  { %v391_v1 = vrot.slane %v337_v45, %v679_v12  ;;  %v395_v31 = vrot.slane %v337_v45, %v677_v11  ;;  %v399_v33 = vrot.slane %v337_v45, %v695_v16  ;;  %v403_v34 = vrot.slane %v337_v45, %v693_v15  ;;  %v1030_v16 = vld [vmem:[#allocation9_spill] sm:$0xff] }
  0xbc   :  { %v420_v28 = vsel %vm836_vm1, %v343_v26, %v663_v8  ;;  %v421_v3 = vsel %vm841_vm2, %v347_v27, %v675_v10  ;;  %v422_v2 = vsel %vm845_vm3, %v351_v51, %v659_v7  ;;  %v423_v4 = vsel %vm849_vm4, %v355_v19, %v671_v9 }
  0xbd   :  { %v424_v5 = vsel %vm854_vm5, %v359_v52, %v691_v14  ;;  %v425_v8 = vsel %vm858_vm6, %v363_v57, %v687_v13  ;;  %v426_v10 = vsel %vm862_vm7, %v367_v58, %v707_v18  ;;  %v427_v7 = vsel %vm866_vm8, %v371_v59, %v703_v17  ;;  %v1031_v18 = vld [vmem:[#allocation8_spill] sm:$0xff] }
  0xbe   :  { %v428_v9 = vsel %vm870_vm9, %v375_v60, %v721_v21  ;;  %v429_v11 = vsel %vm874_vm10, %v379_v62, %v717_v20  ;;  %v430_v12 = vsel %vm879_vm11, %v383_v63, %v733_v23  ;;  %v431_v13 = vsel %vm883_vm12, %v387_v0, %v729_v22 }
  0xbf   :  { %v432_v14 = vsel %vm887_vm13, %v391_v1, %v745_v25  ;;  %v433_v15 = vsel %vm892_vm14, %v395_v31, %v741_v24  ;;  %v434_v17 = vsel %vm896_vm15, %v399_v33, %v1030_v16  ;;  %v435_v20 = vsel %vm900_vm0, %v403_v34, %v1031_v18 }
  0xc0   :  { %v452_v21 = vcombine.low %v420_v28, %v421_v3  ;;  %v453_v23 = vcombine.low %v422_v2, %v423_v4  ;;  %v454_v47 = vcombine.low %v424_v5, %v425_v8  ;;  %v455_v22 = vcombine.low %v426_v10, %v427_v7 }
  0xc1   :  { %v501_v32 = vcombine.low %v428_v9, %v429_v11  ;;  %v502_v48 = vcombine.low %v430_v12, %v431_v13  ;;  %v503_v53 = vcombine.low %v432_v14, %v433_v15  ;;  %v504_v25 = vcombine.low %v434_v17, %v435_v20 }
  0xc2   :  { %v462_v54 = vrot.slane %v452_v21, %v772_v38  ;;  %v469_v24 = vrot.slane %v453_v23, %v772_v38  ;;  %v476_v55 = vrot.slane %v454_v47, %v772_v38  ;;  %v483_v46 = vrot.slane %v455_v22, %v772_v38 }
  0xc3   :  { %v511_v56 = vrot.slane %v501_v32, %v772_v38  ;;  %v518_v61 = vrot.slane %v502_v48, %v772_v38  ;;  %v525_v35 = vrot.slane %v503_v53, %v772_v38  ;;  %v532_v30 = vrot.slane %v504_v25, %v772_v38 }
  0xc4   :  { %v484_v37 = vcombine.low %v462_v54, %v469_v24  ;;  %v485_v39 = vcombine.low %v476_v55, %v483_v46 }
  0xc5   :  { %v533_v40 = vcombine.low %v511_v56, %v518_v61  ;;  %v534_v41 = vcombine.low %v525_v35, %v532_v30 }
  0xc6   :  { %v492_v36 = vrot.slane %v484_v37, %v772_v38  ;;  %v499_v43 = vrot.slane %v485_v39, %v772_v38 }
  0xc7   :  { %v541_v42 = vrot.slane %v533_v40, %v772_v38  ;;  %v548_v29 = vrot.slane %v534_v41, %v772_v38 }
  0xc8   :  { %v500_v44 = vcombine.low %v492_v36, %v499_v43 }
  0xc9   :  { %v549_v45 = vcombine.low %v541_v42, %v548_v29 }
  0xca   :  { %552 = vst [vmem:[#allocation5] sm:$0xff] %v500_v44 }
  0xcb   :  { %553 = vst [vmem:[#allocation5 + $0x8] sm:$0xff] %v549_v45 }
  0xcc   :  { %606 = shalt.err (!%p603_p12)
}
  0xcd   :  { %s607_s23 = scalar_lea.hbm %s993_s1, 256 }
  0xce   :  { %p608_p13 = scmp.ne.s32.totalorder %s993_s1, %s607_s23  ;;  %p611_p0 = scmp.lt.u32.totalorder %s607_s23, %s993_s1 }
  0xd0   :  { %p613_p1 = pnand %p611_p0, %p608_p13 }
  0xd2   :  { %616 = shalt.err (!%p613_p1)
}
  0xd3   :  { %563 = dma.vmem_to_hbm [thread:$0]  %s561_s19, 256, %s993_s1, [#allocation4]  }
  0xd4   :  { %619 = dma.done.wait [#allocation4], 256  }
  0xd5   :  { %620 = vsyncadd [#allocation4], 4294967040 }
  0xd6   :  { %567 = vsyncpa [#allocation3], 1 }
  0xd7   :  { %568 = vsyncpa [#allocation4], 1 }

</bundles_post_ra>
